<compile_context>
chip_gen: v5e
topology: v5e:2x2
jax: 0.10.0
libtpu: 0.0.40
codegen_flags: <defaults>
</compile_context>

<pallas_src>
import math

import jax
import jax.numpy as jnp
from jax.experimental import pallas as pl
from jax.experimental.pallas import tpu as pltpu

N_S1_JOINT = 22
FULL_BODY_NODE = list(range(N_S1_JOINT))   # [0..21] == identity selection

_LANE = 128


def _round_up(x, m):
    return ((x + m - 1) // m) * m


def _physical_vmem_bytes():
    """Per-core VMEM capacity; conservative fallback if the query fails."""
    try:
        info = pltpu.get_tpu_info()
        v = getattr(info, "vmem_capacity_bytes", None)
        if v:
            return int(v)
    except Exception:
        pass
    return 64 * 1024 * 1024   # v7x per-core size (smallest of v5e/v6e/v7x)


# --------------------------------------------------------------------------
# Kernels
# --------------------------------------------------------------------------
def _avg_vpu_kernel(x_ref, o_ref):
    """x_ref: (tm, 22*C) with C % 128 == 0, o_ref: (tm, C).

    Pure VPU path: 22 lane-aligned C-wide slice adds (no MXU, no weights).
    Each slice is upcast to f32 on the fly; no whole-tile upcast."""
    c = o_ref.shape[-1]
    acc = x_ref[:, 0:c].astype(jnp.float32)
    for j in range(1, N_S1_JOINT):
        acc = acc + x_ref[:, j * c:(j + 1) * c].astype(jnp.float32)
    o_ref[...] = (acc * (1.0 / N_S1_JOINT)).astype(o_ref.dtype)


def _avg_matmul_kernel(x_ref, w_ref, o_ref):
    """x_ref: (tm, K), w_ref: (K, N) block-diagonal averaging weights
    (constant index_map -> fetched once, VMEM resident), o_ref: (tm, N).
    Inputs are fed to the MXU in their own dtype; accumulation is f32."""
    o_ref[...] = jnp.dot(
        x_ref[...], w_ref[...], preferred_element_type=jnp.float32
    ).astype(o_ref.dtype)


# --------------------------------------------------------------------------
# Tiling / pallas_call plumbing
# --------------------------------------------------------------------------
def _pick_row_tile(n_rows, in_row_elems, out_row_elems, itemsize, extra_vmem_bytes):
    """Row-tile size + explicit VMEM limit for a 2-D row-slab pipeline."""
    sub = max(8, 32 // itemsize)                      # sublane packing: 8/16/32
    in_row_vmem = _round_up(in_row_elems, _LANE) * itemsize
    out_row_vmem = _round_up(out_row_elems, _LANE) * itemsize
    acc_row_vmem = _round_up(out_row_elems, _LANE) * 4          # f32 accumulator
    per_row = 2 * (in_row_vmem + out_row_vmem) + acc_row_vmem   # double-buffered

    phys = _physical_vmem_bytes()
    budget = min(24 << 20, phys * 2 // 5)             # budget for the tile buffers
    tm = max(sub, (budget // per_row) // sub * sub)
    tm = min(tm, 32768)
    if n_rows % sub == 0:
        tm = min(tm, n_rows)
    elif n_rows > sub:
        tm = min(tm, (n_rows // sub) * sub)           # keep block inside the array
    else:
        tm = n_rows                                   # tiny input: block == array

    need = tm * per_row + extra_vmem_bytes
    vmem_limit = int(min(max(need + (8 << 20), 32 << 20), phys * 2 // 3))
    vmem_limit = max(vmem_limit, need + (2 << 20))
    return tm, vmem_limit


def _pooling_call(kernel, x2, out_cols, tm, vmem_limit, extra_inputs, extra_specs,
                  flops, bytes_accessed):
    n_slab, in_cols = x2.shape
    grid = (pl.cdiv(n_slab, tm),)                     # ragged last block OK
    return pl.pallas_call(
        kernel,
        out_shape=jax.ShapeDtypeStruct((n_slab, out_cols), x2.dtype),
        grid_spec=pltpu.PrefetchScalarGridSpec(
            num_scalar_prefetch=0,
            grid=grid,
            in_specs=[pl.BlockSpec((tm, in_cols), lambda i: (i, 0))] + extra_specs,
            out_specs=pl.BlockSpec((tm, out_cols), lambda i: (i, 0)),
        ),
        compiler_params=pltpu.CompilerParams(
            dimension_semantics=("parallel",),
            vmem_limit_bytes=vmem_limit,
        ),
        cost_estimate=pl.CostEstimate(
            flops=flops, transcendentals=0, bytes_accessed=bytes_accessed),
    )(x2, *extra_inputs)


# --------------------------------------------------------------------------
# Public wrapper
# --------------------------------------------------------------------------
def humanml_init_s1_to_s4(s1_input):
    """(bs, n_frame, 22, n_channel) -> (bs, n_frame, n_channel)."""
    bs, n_frame, n_joint, n_channel = s1_input.shape
    assert n_joint == N_S1_JOINT, f"expected {N_S1_JOINT} joints, got {n_joint}"
    # full_body_node == [0..21] selects every joint, so the gather is a no-op.

    dtype = s1_input.dtype
    itemsize = jnp.dtype(dtype).itemsize
    n_rows = bs * n_frame
    jc = N_S1_JOINT * n_channel

    base_flops = 2 * n_rows * N_S1_JOINT * n_channel          # true reduction work
    io_bytes = (n_rows * jc + n_rows * n_channel) * itemsize

    # ---- Path 1: C lane-aligned -> pure VPU reduction, no weights, no MXU.
    if n_channel % _LANE == 0:
        x2 = s1_input.reshape(n_rows, jc)                     # free, contiguous
        tm, vmem_limit = _pick_row_tile(n_rows, jc, n_channel, itemsize, 0)
        out2 = _pooling_call(_avg_vpu_kernel, x2, n_channel, tm, vmem_limit,
                             [], [], base_flops, io_bytes)
        return out2.reshape(bs, n_frame, n_channel)

    # ---- Paths 2/3: block-diagonal averaging matmul, W DMA'd once.
    w_dtype = jnp.float32 if dtype == jnp.float32 else dtype   # f32 W for f32 x
    w_small = jnp.tile(jnp.eye(n_channel, dtype=jnp.float32),
                       (N_S1_JOINT, 1)) * (1.0 / N_S1_JOINT)   # (22*C, C)

    # Regroup G consecutive rows so both slabs are lane-dense (G*C % 128 == 0):
    # full-burst DMA rows in and unmasked full-width stores out.
    g = _LANE // math.gcd(n_channel, _LANE)
    w_group_bytes = (g * jc) * (g * n_channel) * jnp.dtype(w_dtype).itemsize
    use_group = g > 1 and n_rows % g == 0 and w_group_bytes <= (4 << 20)

    if use_group:
        w = jnp.kron(jnp.eye(g, dtype=jnp.float32), w_small).astype(w_dtype)
        x2 = s1_input.reshape(n_rows // g, g * jc)             # free, contiguous
        out_cols = g * n_channel
    else:
        # Fallback (n_rows not divisible by G, or grouped W too large): output
        # stays lane-sparse, but there is still no pad and no per-step W build.
        w = w_small.astype(w_dtype)
        x2 = s1_input.reshape(n_rows, jc)
        out_cols = n_channel

    w_vmem = 2 * _round_up(w.shape[0], 8) * _round_up(w.shape[1], _LANE) * w.dtype.itemsize
    tm, vmem_limit = _pick_row_tile(x2.shape[0], x2.shape[1], out_cols, itemsize, w_vmem)
    w_spec = pl.BlockSpec(tuple(w.shape), lambda i: (0, 0))    # resident constant
    out2 = _pooling_call(_avg_matmul_kernel, x2, out_cols, tm, vmem_limit,
                         [w], [w_spec], base_flops,
                         io_bytes + int(w.size) * w.dtype.itemsize)
    return out2.reshape(bs, n_frame, n_channel)


def _reference(s1_input):
    """Plain-JAX mirror of the PyTorch forward."""
    bs, n_frame = s1_input.shape[:2]
    pooled = jnp.mean(s1_input[:, :, FULL_BODY_NODE, :], axis=2)
    return pooled.reshape(bs, n_frame, -1)


if __name__ == "__main__":
    root = jax.random.PRNGKey(0)

    def _check(shape, dtype, atol, rtol):
        x = jax.random.normal(root, shape, dtype=jnp.float32).astype(dtype)
        out = jax.block_until_ready(humanml_init_s1_to_s4(x))
        assert out.shape == (shape[0], shape[1], shape[3]), out.shape
        ref = _reference(x.astype(jnp.float32))
        assert jnp.allclose(out.astype(jnp.float32), ref, atol=atol, rtol=rtol), \
            f"mismatch vs reference for shape={shape} dtype={dtype}"

    # Module-sized example from the spec (flat matmul fallback path, C = 4).
    _check((2, 8, N_S1_JOINT, 4), jnp.float32, 1e-5, 1e-5)
    # Ragged final grid block (no wrapper-side padding any more).
    _check((3, 7, N_S1_JOINT, 4), jnp.float32, 1e-5, 1e-5)
    # Lane-dense grouped-matmul path (32 consecutive rows regrouped per slab).
    _check((8, 32, N_S1_JOINT, 4), jnp.float32, 1e-5, 1e-5)
    # Lane-aligned pure-VPU reduction path (C % 128 == 0, no weights at all).
    _check((2, 16, N_S1_JOINT, 128), jnp.float32, 1e-5, 1e-5)
    # bf16 input: straight to the MXU, f32 accumulation, no whole-tile upcast.
    _check((2, 8, N_S1_JOINT, 4), jnp.bfloat16, 2e-2, 2e-2)

    print("KERNEL_OK")
</pallas_src>

<mosaic_0001>
module attributes {stable_mosaic.version = 11 : i64} {
  func.func @_avg_matmul_kernel(%arg0: i32, %arg1: memref<16x88xf32, #tpu.memory_space<vmem>>, %arg2: memref<88x4xf32, #tpu.memory_space<vmem>>, %arg3: memref<16x4xf32, #tpu.memory_space<vmem>>) attributes {dimension_semantics = [#tpu.dimension_semantics<parallel>], iteration_bounds = array<i64: 1>, scalar_prefetch = 0 : i64, scratch_operands = 0 : i64, tpu.core_type = #tpu.core_type<tc>, window_params = [{transform_indices = @transform_0, window_bounds = array<i64: 16, 88>}, {pipeline_mode = #tpu.pipeline_mode<synchronous>, transform_indices = @transform_1, window_bounds = array<i64: 88, 4>}, {transform_indices = @transform_2, window_bounds = array<i64: 16, 4>}]} {
    %c0 = arith.constant 0 : index
    %c0_0 = arith.constant 0 : index
    %0 = vector.load %arg1[%c0, %c0_0] : memref<16x88xf32, #tpu.memory_space<vmem>>, vector<16x88xf32>
    %c0_1 = arith.constant 0 : index
    %c0_2 = arith.constant 0 : index
    %1 = vector.load %arg2[%c0_1, %c0_2] : memref<88x4xf32, #tpu.memory_space<vmem>>, vector<88x4xf32>
    %cst = arith.constant dense<0.000000e+00> : vector<16x4xf32>
    %2 = tpu.matmul %0, %1, %cst {dimension_numbers = #tpu.dot_dimension_numbers<[1], [0], [0], [1], [0, 0, 1, 1], [], []>} : vector<16x88xf32>, vector<88x4xf32>, vector<16x4xf32> -> vector<16x4xf32>
    %c0_3 = arith.constant 0 : index
    %c0_4 = arith.constant 0 : index
    %3 = vector.load %arg3[%c0_3, %c0_4] : memref<16x4xf32, #tpu.memory_space<vmem>>, vector<16x4xf32>
    tpu.vector_store %arg3[%c0_3, %c0_4], %2 {strides = array<i32>} : memref<16x4xf32, #tpu.memory_space<vmem>>, vector<16x4xf32>,
    return
  }
  func.func @transform_0(%arg0: i32) -> (i32, i32) {
    %c0_i32 = arith.constant 0 : i32
    %c0_i32_0 = arith.constant 0 : i32
    return %arg0, %c0_i32 : i32, i32
  }
  func.func @transform_1(%arg0: i32) -> (i32, i32) {
    %c0_i32 = arith.constant 0 : i32
    %c0_i32_0 = arith.constant 0 : i32
    %c0_i32_1 = arith.constant 0 : i32
    return %c0_i32, %c0_i32_0 : i32, i32
  }
  func.func @transform_2(%arg0: i32) -> (i32, i32) {
    %c0_i32 = arith.constant 0 : i32
    %c0_i32_0 = arith.constant 0 : i32
    return %arg0, %c0_i32 : i32, i32
  }
}

</mosaic_0001>

<bundles_post_ra>
// kernel: tpu_custom_call.1
= control target key start
LH: loop header
LB: loop body
LE: loop exit
PB: predicated region body
PF: predicated region fallthrough
CT: control target
= control target key end

     0   :  { %vm24_vm0 = vcmask 719872   ;;  %vm54_vm1 = vcmask 31744   ;;  %s134_s1 = inlined_call_operand.vmem [shape: f32[88,4], index: 1, kind: input, shape index: {}]   ;;  %s135_s0 = inlined_call_operand.vmem [shape: f32[16,88], index: 0, kind: input, shape index: {}]   ;;  %s136_s2 = inlined_call_operand.vmem [shape: f32[16,4], index: 2, kind: output, shape index: {}]  }
   0x1   :  { %v23_v0 = vld [vmem:[%s134_s1 + $0x50] sm:$0xff]  ;;  %v22_v1 = vld [vmem:[%s134_s1 + $0x48] sm:$0xff]  ;;  %v21_v2 = vld [vmem:[%s134_s1 + $0x40] sm:$0xff] }
   0x2   :  { %36 = vmatpush.msra.mxu0 %v23_v0  ;;  %63 = vmatpush.msra.mxu1 %v23_v0  ;;  %v20_v3 = vld [vmem:[%s134_s1 + $0x38] sm:$0xff]  ;;  %v19_v4 = vld [vmem:[%s134_s1 + $0x30] sm:$0xff]  ;;  %v18_v5 = vld [vmem:[%s134_s1 + $0x28] sm:$0xff] }
   0x3   :  { %v17_v6 = vld [vmem:[%s134_s1 + $0x20] sm:$0xff]  ;;  %v16_v7 = vld [vmem:[%s134_s1 + $0x18] sm:$0xff]  ;;  %v15_v8 = vld [vmem:[%s134_s1 + $0x10] sm:$0xff] }
   0x4   :  { %37 = vmatpush.msra.mxu0 %v22_v1  ;;  %64 = vmatpush.msra.mxu1 %v22_v1  ;;  %v14_v9 = vld [vmem:[%s134_s1 + $0x8] sm:$0xff]  ;;  %v13_v10 = vld [vmem:[%s134_s1] sm:$0xff] }
   0x5   :  { %v11_v11 = vld [vmem:[%s135_s0] sm:$0xff]  ;;  %v12_v12 = vld [vmem:[%s135_s0 + $0x8] sm:$0xff] }
   0x6   :  { %38 = vmatpush.msra.mxu0 %v21_v2  ;;  %65 = vmatpush.msra.mxu1 %v21_v2 }
   0x8   :  { %39 = vmatpush.msra.mxu0 %v20_v3  ;;  %66 = vmatpush.msra.mxu1 %v20_v3 }
   0xa   :  { %40 = vmatpush.msra.mxu0 %v19_v4  ;;  %67 = vmatpush.msra.mxu1 %v19_v4 }
   0xc   :  { %41 = vmatpush.msra.mxu0 %v18_v5  ;;  %68 = vmatpush.msra.mxu1 %v18_v5 }
   0xe   :  { %42 = vmatpush.msra.mxu0 %v17_v6  ;;  %69 = vmatpush.msra.mxu1 %v17_v6 }
  0x10   :  { %43 = vmatpush.msra.mxu0 %v16_v7  ;;  %70 = vmatpush.msra.mxu1 %v16_v7 }
  0x12   :  { %44 = vmatpush.msra.mxu0 %v15_v8  ;;  %71 = vmatpush.msra.mxu1 %v15_v8 }
  0x14   :  { %45 = vmatpush.msra.mxu0 %v14_v9  ;;  %72 = vmatpush.msra.mxu1 %v14_v9 }
  0x16   :  { %46 = vmatpush.msra.mxu0 %v13_v10  ;;  %73 = vmatpush.msra.mxu1 %v13_v10 }
  0x17   :  { %61 = vmatmul.msk.f32.vlgmr.msra.gmra.mxu0 %vm24_vm0, %v11_v11  ;;  %62 = vmatmul.msk.f32.vlgmr.msra.gmra.mxu1 %vm24_vm0, %v12_v12 }
  0x94   :  { %v48_v13 = vpop.f32.mrf.mxu0  ;;  %v51_v14 = vpop.f32.mrf.mxu1 }
  0x95   :  { %55 = vst.msk [vmem:[%s136_s2] sm:$0xff] %vm54_vm1, %v48_v13 }
  0x96   :  { %56 = vst.msk [vmem:[%s136_s2 + $0x8] sm:$0xff] %vm54_vm1, %v51_v14 }

</bundles_post_ra>
